<compile_context>
chip_gen: v6e
topology: v6e:2x2x1
jax: 0.10.0
libtpu: 0.0.40
codegen_flags: <defaults>
</compile_context>

<pallas_src>
import functools

import jax
import jax.numpy as jnp
from jax.experimental import pallas as pl
from jax.experimental.pallas import tpu as pltpu
import numpy as np

_MIB = 1024 * 1024


def _tpu_memory_config():
    """Per-generation VMEM limit / tile budget and a 2-TensorCore hint."""
    kind = ""
    try:
        kind = jax.devices()[0].device_kind.lower()
    except Exception:
        pass
    cap = None
    try:
        cap = int(pltpu.get_tpu_info().vmem_capacity_bytes)
    except Exception:
        cap = None
    if cap is None or cap <= 0:
        cap = 64 * _MIB if "v7" in kind else 128 * _MIB
    # 2 TensorCores per chip on v7x / v4 / v5p; 1 on v5e / v6e.
    two_tc = ("v7" in kind or "v4" in kind or
              ("v5" in kind and "lite" not in kind and "5e" not in kind))
    # v6e/v5e (128 MiB): limit 96 MiB.  v7x (64 MiB): limit 48 MiB.
    vmem_limit = max(32 * _MIB, min(cap - 16 * _MIB, 96 * _MIB))
    budget = vmem_limit // 2          # per-step tile-footprint target (headroom)
    return vmem_limit, budget, two_tc


def _choose_tiles(Bp, S, E2, Dd, budget, two_tc, max_ts=None):
    """Pick (TB, TS).

    TB (batch tile) is either the whole padded batch or a multiple of 128 so the
    (S_pad, TB) output block is lane-legal; TS (src_len tile) is the largest
    multiple of 8 whose per-step footprint fits the VMEM budget.  Keeping TB as
    large as possible also keeps the strided enc-DMA segments (TB*E2*4 bytes)
    well above descriptor-latency territory.
    """
    f32 = 4

    def s_pad_for(ts):
        return pl.cdiv(S, ts) * ts

    def footprint(ts, tb):
        enc = 2 * ts * tb * E2 * f32                 # double-buffered encoder block
        tmp = 2 * ts * tb * Dd * f32                 # eproj + energy live together
        outb = 2 * s_pad_for(ts) * tb * f32          # src_len-resident scores block
        hid = 3 * tb * Dd * f32                      # hidden block (x2) + hproj scratch
        wts = f32 * (Dd * Dd + E2 * Dd + 2 * Dd)     # weights / bias / v
        return enc + tmp + outb + hid + wts

    def round128(x):
        return max(128, ((x + 127) // 128) * 128)

    # ---- batch tile ----
    if Bp <= 128:
        tb = Bp                                      # single full-(padded-)batch tile
    else:
        tb = min(512, (Bp // 128) * 128)
        if two_tc:                                   # keep both TensorCores busy / even
            n_b = pl.cdiv(Bp, tb)
            if n_b == 1 and Bp >= 256:
                tb = round128(pl.cdiv(Bp, 2))
            elif n_b > 1 and n_b % 2 == 1:
                tb = round128(pl.cdiv(Bp, n_b + 1))
        while tb > 128 and footprint(8, tb) > budget:
            tb -= 128

    # ---- src_len tile: largest multiple of 8 that fits the budget ----
    ts = pl.cdiv(S, 8) * 8
    if max_ts is not None:
        ts = min(ts, max(8, (max_ts // 8) * 8))
    while ts > 8 and footprint(ts, tb) > budget:
        ts = max(8, ((ts // 2) + 7) // 8 * 8)
    return tb, ts


def _attention_kernel(h_ref, enc_ref, whT_ref, weT_ref, bias_ref, v_ref,
                      out_ref, hproj_ref, *, src_len):
    TS, TB, E2 = enc_ref.shape
    Dd = whT_ref.shape[0]
    S_pad = out_ref.shape[0]
    j = pl.program_id(1)
    n_s = pl.num_programs(1)

    # Hidden projection with the bias folded in: once per batch tile, kept in scratch.
    @pl.when(j == 0)
    def _():
        hproj_ref[...] = (
            jnp.dot(h_ref[...], whT_ref[...], preferred_element_type=jnp.float32)
            + bias_ref[...]
        )

    # Encoder projection for this src_len chunk.  TB % 8 == 0, so collapsing the
    # (TS, TB) leading dims onto the MXU M-dim is a tile-aligned, copy-free
    # re-labeling of the VMEM layout (no relayout traffic).
    eproj = jnp.dot(enc_ref[...].reshape(TS * TB, E2), weT_ref[...],
                    preferred_element_type=jnp.float32).reshape(TS, TB, Dd)

    # energy = tanh(e @ W_e^T + (h @ W_h^T + b))                (TS, TB, Dd)
    energy = jnp.tanh(eproj + hproj_ref[...][None, :, :])

    # scores[s, t] = energy[s, t, :] . v                        (TS, TB)
    scores = jnp.sum(energy * v_ref[...], axis=-1)

    # Stage raw scores into the src_len-resident output block (no HBM traffic
    # until the batch-tile index changes).
    out_ref[pl.ds(pl.multiple_of(j * TS, TS), TS), :] = scores

    # Final src_len step: masked, numerically stable softmax over src_len,
    # reducing over the LEADING axis (no XLU transpose anywhere in the kernel).
    @pl.when(j == n_s - 1)
    def _():
        sc = out_ref[...]
        if S_pad != src_len:                        # mask zero-padded src rows
            row = jax.lax.broadcasted_iota(jnp.int32, (S_pad, TB), 0)
            sc = jnp.where(row < src_len, sc, -jnp.inf)
        m = jnp.max(sc, axis=0, keepdims=True)
        ex = jnp.exp(sc - m)
        denom = jnp.sum(ex, axis=0, keepdims=True)
        # EUP approximate reciprocal + one Newton step: divide stays off the VPU
        # while remaining well within f32 tolerance.
        inv = pl.reciprocal(denom, approx=True)
        inv = inv * (2.0 - denom * inv)
        out_ref[...] = ex * inv


def attention_pallas(hidden, encoder_outputs, W, b, v, *, max_ts=None):
    """hidden: (B, Dd); encoder_outputs: (S, B, 2*Eenc); W: (Dd, 2*Eenc+Dd); b, v: (Dd,)."""
    S, B, E2 = encoder_outputs.shape
    Dd = hidden.shape[1]

    hidden = hidden.astype(jnp.float32)
    encoder_outputs = encoder_outputs.astype(jnp.float32)

    # Split the Linear weight so cat([hidden, enc]) never materializes.
    WhT = jnp.asarray(W[:, :Dd].T, dtype=jnp.float32)    # (Dd, Dd)  acts on hidden
    WeT = jnp.asarray(W[:, Dd:].T, dtype=jnp.float32)    # (E2, Dd)  acts on enc outputs
    bias = jnp.asarray(b, dtype=jnp.float32).reshape(1, Dd)
    v2 = jnp.asarray(v, dtype=jnp.float32).reshape(1, Dd)
    # TODO(synk): optionally cast enc/WeT to bf16 for the eproj matmul (f32 MXU is
    # multi-pass, worst on v7x); kept f32 here to preserve tight numerics.

    vmem_limit, budget, two_tc = _tpu_memory_config()

    Bp = ((B + 7) // 8) * 8                              # sublane-align the batch
    TB, TS = _choose_tiles(Bp, S, E2, Dd, budget, two_tc, max_ts=max_ts)
    S_pad = pl.cdiv(S, TS) * TS                          # src_len rounded to the tile

    if Bp != B:
        hidden = jnp.pad(hidden, ((0, Bp - B), (0, 0)))
    if Bp != B or S_pad != S:
        encoder_outputs = jnp.pad(encoder_outputs,
                                  ((0, S_pad - S), (0, Bp - B), (0, 0)))

    grid = (pl.cdiv(Bp, TB), S_pad // TS)
    kernel = functools.partial(_attention_kernel, src_len=S)

    scores = pl.pallas_call(
        kernel,
        out_shape=jax.ShapeDtypeStruct((S_pad, Bp), jnp.float32),
        grid=grid,
        in_specs=[
            pl.BlockSpec((TB, Dd), lambda i, j: (i, 0)),          # hidden batch tile
            pl.BlockSpec((TS, TB, E2), lambda i, j: (j, i, 0)),   # enc outputs, time-major
            pl.BlockSpec((Dd, Dd), lambda i, j: (0, 0)),          # W_h^T
            pl.BlockSpec((E2, Dd), lambda i, j: (0, 0)),          # W_e^T
            pl.BlockSpec((1, Dd), lambda i, j: (0, 0)),           # bias
            pl.BlockSpec((1, Dd), lambda i, j: (0, 0)),           # v
        ],
        # (S_pad, TB) block, constant over the src_len axis -> resident in VMEM
        # across j and written back to HBM once per batch tile.
        out_specs=pl.BlockSpec((S_pad, TB), lambda i, j: (0, i)),
        scratch_shapes=[pltpu.VMEM((TB, Dd), jnp.float32)],       # hidden projection
        compiler_params=pltpu.CompilerParams(
            dimension_semantics=("parallel", "arbitrary"),
            vmem_limit_bytes=int(vmem_limit),
        ),
    )(hidden, encoder_outputs, WhT, WeT, bias, v2)

    # Drop padding; transpose the small (S, B) result outside the kernel.
    return scores[:S, :B].T


def attention_ref(hidden, encoder_outputs, W, b, v):
    """Pure-JAX reference with exact PyTorch-forward semantics."""
    S = encoder_outputs.shape[0]
    h_rep = jnp.repeat(hidden[:, None, :], S, axis=1)        # (B, S, Dd)
    enc = jnp.transpose(encoder_outputs, (1, 0, 2))          # (B, S, 2E)
    x = jnp.concatenate([h_rep, enc], axis=2)
    energy = jnp.tanh(x @ W.T + b)                           # (B, S, Dd)
    scores = jnp.einsum("bsd,d->bs", energy, v)              # (B, S)
    return jax.nn.softmax(scores, axis=1)


if __name__ == "__main__":
    def run_case(key, B, S, enc_hid_dim, dec_hid_dim, **tile_overrides):
        E2 = 2 * enc_hid_dim
        k1, k2, k3, k4, k5 = jax.random.split(key, 5)
        hidden = jax.random.normal(k1, (B, dec_hid_dim), dtype=jnp.float32)
        encoder_outputs = jax.random.normal(k2, (S, B, E2), dtype=jnp.float32)
        # Same parameter shapes as nn.Linear / nn.Parameter in __init__.
        W = jax.random.normal(k3, (dec_hid_dim, E2 + dec_hid_dim), dtype=jnp.float32) * 0.1
        b = jax.random.normal(k4, (dec_hid_dim,), dtype=jnp.float32) * 0.1
        v = jax.random.uniform(k5, (dec_hid_dim,), dtype=jnp.float32)   # torch.rand(dec_hid_dim)

        out = jax.block_until_ready(
            attention_pallas(hidden, encoder_outputs, W, b, v, **tile_overrides))
        ref = attention_ref(hidden, encoder_outputs, W, b, v)
        np.testing.assert_allclose(np.asarray(out), np.asarray(ref), rtol=1e-4, atol=1e-5)
        assert out.shape == (B, S)

    key = jax.random.PRNGKey(0)
    k1, k2, k3 = jax.random.split(key, 3)
    # Small shapes consistent with the module (batch=2, src_len=8, enc=16, dec=32).
    run_case(k1, B=2, S=8, enc_hid_dim=16, dec_hid_dim=32)
    # Forced small src_len tiles: multi S-step staged softmax + S padding/masking.
    run_case(k2, B=24, S=40, enc_hid_dim=32, dec_hid_dim=64, max_ts=16)
    # Multiple batch tiles (TB=128, partial last block) + multi S-step path.
    run_case(k3, B=136, S=24, enc_hid_dim=16, dec_hid_dim=32, max_ts=8)

    print("KERNEL_OK")
</pallas_src>

<mosaic_0001>
module attributes {stable_mosaic.version = 11 : i64} {
  func.func @_attention_kernel(%arg0: i32, %arg1: i32, %arg2: memref<8x32xf32, #tpu.memory_space<vmem>>, %arg3: memref<8x8x32xf32, #tpu.memory_space<vmem>>, %arg4: memref<32x32xf32, #tpu.memory_space<vmem>>, %arg5: memref<32x32xf32, #tpu.memory_space<vmem>>, %arg6: memref<1x32xf32, #tpu.memory_space<vmem>>, %arg7: memref<1x32xf32, #tpu.memory_space<vmem>>, %arg8: memref<8x8xf32, #tpu.memory_space<vmem>>, %arg9: memref<8x32xf32, #tpu.memory_space<vmem>>) attributes {dimension_semantics = [#tpu.dimension_semantics<parallel>, #tpu.dimension_semantics<arbitrary>], iteration_bounds = array<i64: 1, 1>, scalar_prefetch = 0 : i64, scratch_operands = 1 : i64, tpu.core_type = #tpu.core_type<tc>, window_params = [{transform_indices = @transform_0, window_bounds = array<i64: 8, 32>}, {transform_indices = @transform_1, window_bounds = array<i64: 8, 8, 32>}, {pipeline_mode = #tpu.pipeline_mode<synchronous>, transform_indices = @transform_2, window_bounds = array<i64: 32, 32>}, {pipeline_mode = #tpu.pipeline_mode<synchronous>, transform_indices = @transform_3, window_bounds = array<i64: 32, 32>}, {pipeline_mode = #tpu.pipeline_mode<synchronous>, transform_indices = @transform_4, window_bounds = array<i64: 1, 32>}, {pipeline_mode = #tpu.pipeline_mode<synchronous>, transform_indices = @transform_5, window_bounds = array<i64: 1, 32>}, {transform_indices = @transform_6, window_bounds = array<i64: 8, 8>}]} {
    %c0_i32 = arith.constant 0 : i32
    %0 = arith.cmpi eq, %arg1, %c0_i32 : i32
    %1 = arith.extui %0 : i1 to i32
    %c0_i32_0 = arith.constant 0 : i32
    %2 = arith.cmpi ne, %1, %c0_i32_0 : i32
    scf.if %2 {
      %c0_13 = arith.constant 0 : index
      %c0_14 = arith.constant 0 : index
      %25 = vector.load %arg2[%c0_13, %c0_14] : memref<8x32xf32, #tpu.memory_space<vmem>>, vector<8x32xf32>
      %c0_15 = arith.constant 0 : index
      %c0_16 = arith.constant 0 : index
      %26 = vector.load %arg4[%c0_15, %c0_16] : memref<32x32xf32, #tpu.memory_space<vmem>>, vector<32x32xf32>
      %cst_17 = arith.constant dense<0.000000e+00> : vector<8x32xf32>
      %27 = tpu.matmul %25, %26, %cst_17 {dimension_numbers = #tpu.dot_dimension_numbers<[1], [0], [0], [1], [0, 0, 1, 1], [], []>} : vector<8x32xf32>, vector<32x32xf32>, vector<8x32xf32> -> vector<8x32xf32>
      %c0_18 = arith.constant 0 : index
      %c0_19 = arith.constant 0 : index
      %28 = vector.load %arg6[%c0_18, %c0_19] : memref<1x32xf32, #tpu.memory_space<vmem>>, vector<1x32xf32>
      %29 = vector.broadcast %28 : vector<1x32xf32> to vector<8x32xf32>
      %30 = arith.addf %27, %29 : vector<8x32xf32>
      %c0_20 = arith.constant 0 : index
      %c0_21 = arith.constant 0 : index
      %31 = vector.load %arg9[%c0_20, %c0_21] : memref<8x32xf32, #tpu.memory_space<vmem>>, vector<8x32xf32>
      tpu.vector_store %arg9[%c0_20, %c0_21], %30 {strides = array<i32>} : memref<8x32xf32, #tpu.memory_space<vmem>>, vector<8x32xf32>,
    } else {
    }
    %c0 = arith.constant 0 : index
    %c0_1 = arith.constant 0 : index
    %c0_2 = arith.constant 0 : index
    %3 = vector.load %arg3[%c0, %c0_1, %c0_2] : memref<8x8x32xf32, #tpu.memory_space<vmem>>, vector<8x8x32xf32>
    %4 = vector.shape_cast %3 : vector<8x8x32xf32> to vector<64x32xf32>
    %c0_3 = arith.constant 0 : index
    %c0_4 = arith.constant 0 : index
    %5 = vector.load %arg5[%c0_3, %c0_4] : memref<32x32xf32, #tpu.memory_space<vmem>>, vector<32x32xf32>
    %cst = arith.constant dense<0.000000e+00> : vector<64x32xf32>
    %6 = tpu.matmul %4, %5, %cst {dimension_numbers = #tpu.dot_dimension_numbers<[1], [0], [0], [1], [0, 0, 1, 1], [], []>} : vector<64x32xf32>, vector<32x32xf32>, vector<64x32xf32> -> vector<64x32xf32>
    %7 = vector.shape_cast %6 : vector<64x32xf32> to vector<8x8x32xf32>
    %c0_5 = arith.constant 0 : index
    %c0_6 = arith.constant 0 : index
    %8 = vector.load %arg9[%c0_5, %c0_6] : memref<8x32xf32, #tpu.memory_space<vmem>>, vector<8x32xf32>
    %9 = vector.shape_cast %8 : vector<8x32xf32> to vector<1x8x32xf32>
    %10 = vector.broadcast %9 : vector<1x8x32xf32> to vector<8x8x32xf32>
    %11 = arith.addf %7, %10 : vector<8x8x32xf32>
    %12 = math.tanh %11 : vector<8x8x32xf32>
    %c0_7 = arith.constant 0 : index
    %c0_8 = arith.constant 0 : index
    %13 = vector.load %arg7[%c0_7, %c0_8] : memref<1x32xf32, #tpu.memory_space<vmem>>, vector<1x32xf32>
    %14 = vector.shape_cast %13 : vector<1x32xf32> to vector<1x1x32xf32>
    %15 = vector.broadcast %14 : vector<1x1x32xf32> to vector<8x8x32xf32>
    %16 = arith.mulf %12, %15 : vector<8x8x32xf32>
    %cst_9 = arith.constant dense<0.000000e+00> : vector<8x8xf32>
    %17 = vector.multi_reduction <add>, %16, %cst_9 [2] : vector<8x8x32xf32> to vector<8x8xf32>
    %c8_i32 = arith.constant 8 : i32
    %18 = arith.muli %arg1, %c8_i32 : i32
    %19 = tpu.assume_multiple %18, 8 : i32
    %20 = arith.index_cast %19 : i32 to index
    %c0_10 = arith.constant 0 : index
    %21 = vector.load %arg8[%20, %c0_10] : memref<8x8xf32, #tpu.memory_space<vmem>>, vector<8x8xf32>
    tpu.vector_store %arg8[%20, %c0_10], %17 {strides = array<i32>} : memref<8x8xf32, #tpu.memory_space<vmem>>, vector<8x8xf32>,
    %c0_i32_11 = arith.constant 0 : i32
    %22 = arith.cmpi eq, %arg1, %c0_i32_11 : i32
    %23 = arith.extui %22 : i1 to i32
    %c0_i32_12 = arith.constant 0 : i32
    %24 = arith.cmpi ne, %23, %c0_i32_12 : i32
    scf.if %24 {
      %c0_13 = arith.constant 0 : index
      %c0_14 = arith.constant 0 : index
      %25 = vector.load %arg8[%c0_13, %c0_14] : memref<8x8xf32, #tpu.memory_space<vmem>>, vector<8x8xf32>
      %cst_15 = arith.constant dense<0xFF800000> : vector<8xf32>
      %26 = vector.multi_reduction <maximumf>, %25, %cst_15 [0] : vector<8x8xf32> to vector<8xf32>
      %27 = vector.shape_cast %26 : vector<8xf32> to vector<1x8xf32>
      %28 = vector.broadcast %27 : vector<1x8xf32> to vector<8x8xf32>
      %29 = arith.subf %25, %28 : vector<8x8xf32>
      %30 = math.exp %29 : vector<8x8xf32>
      %cst_16 = arith.constant dense<0.000000e+00> : vector<8xf32>
      %31 = vector.multi_reduction <add>, %30, %cst_16 [0] : vector<8x8xf32> to vector<8xf32>
      %32 = vector.shape_cast %31 : vector<8xf32> to vector<1x8xf32>
      %33 = tpu.reciprocal %32 {approx = true} : vector<1x8xf32> -> vector<1x8xf32>
      %34 = arith.mulf %32, %33 : vector<1x8xf32>
      %cst_17 = arith.constant 2.000000e+00 : f32
      %35 = vector.broadcast %cst_17 : f32 to vector<1x8xf32>
      %36 = arith.subf %35, %34 : vector<1x8xf32>
      %37 = arith.mulf %33, %36 : vector<1x8xf32>
      %38 = vector.broadcast %37 : vector<1x8xf32> to vector<8x8xf32>
      %39 = arith.mulf %30, %38 : vector<8x8xf32>
      %c0_18 = arith.constant 0 : index
      %c0_19 = arith.constant 0 : index
      %40 = vector.load %arg8[%c0_18, %c0_19] : memref<8x8xf32, #tpu.memory_space<vmem>>, vector<8x8xf32>
      tpu.vector_store %arg8[%c0_18, %c0_19], %39 {strides = array<i32>} : memref<8x8xf32, #tpu.memory_space<vmem>>, vector<8x8xf32>,
    } else {
    }
    return
  }
  func.func @transform_0(%arg0: i32, %arg1: i32) -> (i32, i32) {
    %c0_i32 = arith.constant 0 : i32
    %c0_i32_0 = arith.constant 0 : i32
    return %arg0, %c0_i32 : i32, i32
  }
  func.func @transform_1(%arg0: i32, %arg1: i32) -> (i32, i32, i32) {
    %c0_i32 = arith.constant 0 : i32
    %c0_i32_0 = arith.constant 0 : i32
    return %arg1, %arg0, %c0_i32 : i32, i32, i32
  }
  func.func @transform_2(%arg0: i32, %arg1: i32) -> (i32, i32) {
    %c0_i32 = arith.constant 0 : i32
    %c0_i32_0 = arith.constant 0 : i32
    %c0_i32_1 = arith.constant 0 : i32
    return %c0_i32, %c0_i32_0 : i32, i32
  }
  func.func @transform_3(%arg0: i32, %arg1: i32) -> (i32, i32) {
    %c0_i32 = arith.constant 0 : i32
    %c0_i32_0 = arith.constant 0 : i32
    %c0_i32_1 = arith.constant 0 : i32
    return %c0_i32, %c0_i32_0 : i32, i32
  }
  func.func @transform_4(%arg0: i32, %arg1: i32) -> (i32, i32) {
    %c0_i32 = arith.constant 0 : i32
    %c0_i32_0 = arith.constant 0 : i32
    %c0_i32_1 = arith.constant 0 : i32
    return %c0_i32, %c0_i32_0 : i32, i32
  }
  func.func @transform_5(%arg0: i32, %arg1: i32) -> (i32, i32) {
    %c0_i32 = arith.constant 0 : i32
    %c0_i32_0 = arith.constant 0 : i32
    %c0_i32_1 = arith.constant 0 : i32
    return %c0_i32, %c0_i32_0 : i32, i32
  }
  func.func @transform_6(%arg0: i32, %arg1: i32) -> (i32, i32) {
    %c0_i32 = arith.constant 0 : i32
    %c0_i32_0 = arith.constant 0 : i32
    return %c0_i32, %arg0 : i32, i32
  }
}

</mosaic_0001>

<bundles_post_ra>
// kernel: tpu_custom_call.1
= control target key start
LH: loop header
LB: loop body
LE: loop exit
PB: predicated region body
PF: predicated region fallthrough
CT: control target
= control target key end

     0   :  { %11 = vsyncpa [#allocation4], 0  ;;  %s771_s0 = inlined_call_operand.hbm [shape: f32[8,32], index: 0, kind: input, shape index: {}]   ;;  %s772_s1 = inlined_call_operand.hbm [shape: f32[8,8,32], index: 1, kind: input, shape index: {}]   ;;  %s773_s2 = inlined_call_operand.hbm [shape: f32[32,32], index: 2, kind: input, shape index: {}]   ;;  %s774_s3 = inlined_call_operand.hbm [shape: f32[32,32], index: 3, kind: input, shape index: {}]   ;;  %s775_s4 = inlined_call_operand.vmem [shape: f32[1,32], index: 4, kind: input, shape index: {}]   ;;  %s776_s5 = inlined_call_operand.vmem [shape: f32[1,32], index: 5, kind: input, shape index: {}]   ;;  %s777_s6 = inlined_call_operand.hbm [shape: f32[8,8], index: 6, kind: output, shape index: {}]  }
   0x1   :  { %12 = vsyncpa [#allocation7], 0 }
   0x2   :  { %13 = vsyncpa [#allocation10], 0 }
   0x3   :  { %14 = vsyncpa [#allocation5], 0  ;;  %s675_s21 = smov [#allocation6]  }
   0x4   :  { %s30_s22 = sshll.u32 %s675_s21, 4  ;;  %s31_s22 = int_to_ptr.vmem [resolvable:$true] %s30_s22 }
   0x5   :  { %s575_s23 = scalar_lea.vmem %s31_s22, 1024  ;;  %p580_p1 = scmp.lt.s32.totalorder %s31_s22, %s31_s22 }
   0x6   :  { %p576_p0 = scmp.ne.s32.totalorder %s31_s22, %s575_s23  ;;  %p581_p2 = scmp.lt.s32.totalorder %s575_s23, %s575_s23 }
   0x8   :  { %p582_p3 = por %p581_p2, %p580_p1 }
   0xa   :  { %p583_p4 = pnand %p582_p3, %p576_p0 }
   0xc   :  { %586 = shalt.err (!%p583_p4)
}
   0xd   :  { %s676_s24 = smov 128   ;;  %s677_s25 = smov 8  }
   0xe   :  { %36 = dma.hbm_to_vmem [thread:$0]  %s772_s1, 1024, %s31_s22, [#allocation7], %s676_s24, %s676_s24, %s677_s25  }
   0xf   :  { %s678_s28 = smov [#allocation3]   ;;  %s679_s30 = smov [#allocation8]  }
  0x10   :  { %s21_s29 = sshll.u32 %s678_s28, 4  ;;  %s42_s7 = sshll.u32 %s679_s30, 4  ;;  %s22_s29 = int_to_ptr.vmem [resolvable:$true] %s21_s29  ;;  %s43_s7 = int_to_ptr.vmem [resolvable:$true] %s42_s7 }
  0x11   :  { %s595_s8 = scalar_lea.vmem %s22_s29, 128  ;;  %p600_p6 = scmp.lt.s32.totalorder %s22_s29, %s22_s29 }
  0x12   :  { %p596_p5 = scmp.ne.s32.totalorder %s22_s29, %s595_s8  ;;  %p601_p7 = scmp.lt.s32.totalorder %s595_s8, %s595_s8 }
  0x14   :  { %p602_p8 = por %p601_p7, %p600_p6 }
  0x16   :  { %p603_p9 = pnand %p602_p8, %p596_p5 }
  0x18   :  { %606 = shalt.err (!%p603_p9)
}
  0x19   :  { %24 = dma.hbm_to_vmem [thread:$0]  %s771_s0, 128, %s22_s29, [#allocation4]  }
  0x1a   :  { %s615_s11 = scalar_lea.vmem %s43_s7, 512  ;;  %p620_p11 = scmp.lt.s32.totalorder %s43_s7, %s43_s7 }
  0x1b   :  { %p616_p10 = scmp.ne.s32.totalorder %s43_s7, %s615_s11  ;;  %p621_p12 = scmp.lt.s32.totalorder %s615_s11, %s615_s11 }
  0x1d   :  { %p622_p13 = por %p621_p12, %p620_p11 }
  0x1f   :  { %p623_p0 = pnand %p622_p13, %p616_p10 }
  0x21   :  { %626 = shalt.err (!%p623_p0)
}
  0x22   :  { %48 = dma.hbm_to_vmem [thread:$0]  %s773_s2, 512, %s43_s7, [#allocation7], %s676_s24, %s676_s24, %s677_s25  }
  0x23   :  { %s680_s13 = smov [#allocation9]  }
  0x24   :  { %s54_s14 = sshll.u32 %s680_s13, 4  ;;  %s55_s14 = int_to_ptr.vmem [resolvable:$true] %s54_s14 }
  0x25   :  { %s635_s15 = scalar_lea.vmem %s55_s14, 512  ;;  %p640_p2 = scmp.lt.s32.totalorder %s55_s14, %s55_s14 }
  0x26   :  { %p636_p1 = scmp.ne.s32.totalorder %s55_s14, %s635_s15  ;;  %p641_p3 = scmp.lt.s32.totalorder %s635_s15, %s635_s15 }
  0x28   :  { %p642_p4 = por %p641_p3, %p640_p2 }
  0x2a   :  { %p643_p5 = pnand %p642_p4, %p636_p1 }
  0x2c   :  { %646 = shalt.err (!%p643_p5)
}
  0x2d   :  { %60 = dma.hbm_to_vmem [thread:$0]  %s774_s3, 512, %s55_s14, [#allocation10], %s676_s24, %s676_s24, %s677_s25  }
  0x2e   :  { %667 = dma.done.wait [#allocation4], 128  }
  0x2f   :  { %668 = vsyncadd [#allocation4], 4294967168 }
  0x30   :  { %669 = dma.done.wait [#allocation7], 1536  }
  0x31   :  { %670 = vsyncadd [#allocation7], 4294965760 }
  0x32   :  { %671 = dma.done.wait [#allocation10], 512  }
  0x33   :  { %672 = vsyncadd [#allocation10], 4294966784  ;;  %v681_v0 = vmov 0.0   ;;  %vm682_vm0 = vmmov 0   ;;  %v85_v1 = vld [vmem:[#allocation8 + $0x18] sm:$0xff]  ;;  %v84_v3 = vld [vmem:[#allocation8 + $0x10] sm:$0xff] }
  0x34   :  { %499 = vmatprep.subr.mxu0 %v681_v0  ;;  %507 = vmatprep.mubr.msk.f32.mxu0 %vm682_vm0, %v681_v0  ;;  %v179_v2 = vld [vmem:[#allocation9 + $0x18] sm:$0xff]  ;;  %v178_v4 = vld [vmem:[#allocation9 + $0x10] sm:$0xff]  ;;  %v83_v5 = vld [vmem:[#allocation8 + $0x8] sm:$0xff]  ;;  %vm93_vm1 = vcmask 261120   ;;  %vm409_vm2 = vcmask 1041409   ;;  %vm411_vm3 = vcmask 1042434  }
  0x35   :  { %500 = vmatpush3.msra.mxu0 %v85_v1  ;;  %530 = vmatprep.subr.mxu1 %v179_v2  ;;  %v177_v6 = vld [vmem:[#allocation9 + $0x8] sm:$0xff]  ;;  %v82_v7 = vld [vmem:[#allocation8] sm:$0xff]  ;;  %v81_v9 = vld [vmem:[#allocation3] sm:$0xff]  ;;  %vm413_vm4 = vcmask 1043459   ;;  %vm415_vm5 = vcmask 1044484   ;;  %vm417_vm6 = vcmask 1045509  }
  0x36   :  { %501 = vmatprep.subr.mxu0 %v681_v0  ;;  %534 = vmatpush3.msra.mxu1 %v179_v2  ;;  %v176_v8 = vld [vmem:[#allocation9] sm:$0xff]  ;;  %v170_v10 = vld [vmem:[#allocation6 + $0x10] sm:$0xff]  ;;  %v171_v11 = vld [vmem:[#allocation6 + $0x18] sm:$0xff]  ;;  %vm419_vm7 = vcmask 1046534   ;;  %vm421_vm8 = vcmask 1047559   ;;  %vm425_vm9 = vcmask 64512  }
  0x37   :  { %502 = vmatpush3.msra.mxu0 %v84_v3  ;;  %531 = vmatprep.subr.mxu1 %v178_v4  ;;  %v172_v12 = vld [vmem:[#allocation6 + $0x20] sm:$0xff]  ;;  %v173_v14 = vld [vmem:[#allocation6 + $0x28] sm:$0xff]  ;;  %v174_v15 = vld [vmem:[#allocation6 + $0x30] sm:$0xff] }
  0x38   :  { %503 = vmatprep.subr.mxu0 %v681_v0  ;;  %535 = vmatpush3.msra.mxu1 %v178_v4  ;;  %v168_v13 = vld [vmem:[#allocation6] sm:$0xff]  ;;  %v169_v16 = vld [vmem:[#allocation6 + $0x8] sm:$0xff]  ;;  %v175_v17 = vld [vmem:[#allocation6 + $0x38] sm:$0xff] }
  0x39   :  { %504 = vmatpush3.msra.mxu0 %v83_v5  ;;  %532 = vmatprep.subr.mxu1 %v177_v6  ;;  %v471_v18 = vld [vmem:[%s775_s4] ss:$0 sm:$0xff] }
  0x3a   :  { %505 = vmatprep.subr.mxu0 %v681_v0  ;;  %536 = vmatpush3.msra.mxu1 %v177_v6  ;;  %v481_v39 = vld [vmem:[%s776_s5] ss:$0 sm:$0xff]  ;;  %v375_v0 = vlaneseq  ;;  %s683_s5 = smov [#allocation11]  }
  0x3b   :  { %506 = vmatpush3.msra.mxu0 %v82_v7  ;;  %533 = vmatprep.subr.mxu1 %v176_v8  ;;  %s460_s18 = sshll.u32 %s683_s5, 4  ;;  %s461_s18 = int_to_ptr.vmem [resolvable:$true] %s460_s18 }
  0x3c   :  { %508 = vmatmul.mubr.msk.f32.vlgmr.msra.gmra.mxu0 %vm93_vm1, %v81_v9  ;;  %510 = vmatprep.subr.mxu0 %v179_v2  ;;  %v378_v3 = vshrl.u32 %v375_v0, 7  ;;  %s647_s19 = scalar_lea.vmem %s461_s18, 128  ;;  %p652_p7 = scmp.lt.s32.totalorder %s461_s18, %s461_s18 }
  0x3d   :  { %537 = vmatpush3.msra.mxu1 %v176_v8  ;;  %521 = vmatprep.mubr.msk.f32.mxu1 %vm93_vm1, %v170_v10  ;;  %p648_p6 = scmp.ne.s32.totalorder %s461_s18, %s647_s19  ;;  %p653_p8 = scmp.lt.s32.totalorder %s647_s19, %s647_s19 }
  0x3e   :  { %511 = vmatpush3.msra.mxu0 %v179_v2  ;;  %522 = vmatmul.mubr.msk.f32.vlgmr.msra.gmra.mxu1 %vm93_vm1, %v171_v11  ;;  %v376_v2 = vand.u32 127, %v375_v0 }
  0x3f   :  { %512 = vmatprep.subr.mxu0 %v178_v4  ;;  %524 = vmatprep.mubr.msk.f32.mxu1 %vm93_vm1, %v172_v12  ;;  %p654_p9 = por %p653_p8, %p652_p7 }
  0x40   :  { %513 = vmatpush3.msra.mxu0 %v178_v4  ;;  %518 = vmatprep.mubr.msk.f32.mxu0 %vm93_vm1, %v168_v13 }
  0x41   :  { %514 = vmatprep.subr.mxu0 %v177_v6  ;;  %p655_p10 = pnand %p654_p9, %p648_p6 }
  0x42   :  { %515 = vmatpush3.msra.mxu0 %v177_v6  ;;  %525 = vmatmul.mubr.msk.f32.gmra.mxu1 %vm93_vm1, %v173_v14  ;;  %v379_v6 = vsub.s32 %v376_v2, %v378_v3 }
  0x43   :  { %516 = vmatprep.subr.mxu0 %v176_v8  ;;  %527 = vmatprep.mubr.msk.f32.mxu1 %vm93_vm1, %v174_v15 }
  0x44   :  { %517 = vmatpush3.msra.mxu0 %v176_v8 }
  0x45   :  { %519 = vmatmul.mubr.msk.f32.vlgmr.msra.gmra.mxu0 %vm93_vm1, %v169_v16 }
  0x46   :  { %528 = vmatmul.mubr.msk.f32.gmra.mxu1 %vm93_vm1, %v175_v17 }
  0xfc   :  { %v163_v19 = vpop.f32.mrf.mxu0 }
  0xfd   :  { %v164_v20 = vadd.f32 %v471_v18, %v163_v19 }
  0xfe   :  { %v523_v21 = vpop.f32.mrf.mxu1  ;;  %v509_v22 = vpop.f32.mrf.mxu0 }
  0xff   :  { %167 = vst.msk [vmem:[#allocation2] sm:$0xff] %vm93_vm1, %v164_v20 }
 0x100   :  { %v281_v23 = vpop.f32.mrf.mxu1 }
 0x102   :  { %v526_v24 = vpop.f32.mrf.mxu1 }
 0x104   :  { %v291_v29 = vpop.f32.mrf.mxu1 }
 0x105   :  { %v520_v25 = vpop.f32.mrf.mxu0 }
 0x106   :  { %v310_v26 = vld [vmem:[#allocation2] sm:$0xff]  ;;  %v529_v33 = vpop.f32.mrf.mxu1 }
 0x107   :  { %v314_v27 = vadd.f32 %v523_v21, %v310_v26  ;;  %v313_v28 = vadd.f32 %v310_v26, %v281_v23  ;;  %v271_v30 = vpop.f32.mrf.mxu0  ;;  %v316_v31 = vadd.f32 %v526_v24, %v310_v26  ;;  %v312_v32 = vadd.f32 %v520_v25, %v310_v26 }
 0x108   :  { %v311_v34 = vadd.f32 %v310_v26, %v271_v30  ;;  %v318_v35 = vadd.f32 %v529_v33, %v310_v26  ;;  %v315_v36 = vadd.f32 %v310_v26, %v291_v29  ;;  %v301_v37 = vpop.f32.mrf.mxu1 }
 0x109   :  { %547 = vtanh.f32 %v314_v27  ;;  %v317_v38 = vadd.f32 %v310_v26, %v301_v37 }
 0x10a   :  { %549 = vtanh.f32 %v313_v28 }
 0x10b   :  { %551 = vtanh.f32 %v316_v31 }
 0x10c   :  { %553 = vtanh.f32 %v312_v32 }
 0x10d   :  { %555 = vtanh.f32 %v311_v34 }
 0x10e   :  { %557 = vtanh.f32 %v318_v35 }
 0x10f   :  { %559 = vtanh.f32 %v315_v36 }
 0x110   :  { %561 = vtanh.f32 %v317_v38 }
 0x116   :  { %v548_v40 = vpop.eup %547 }
 0x117   :  { %v550_v41 = vpop.eup %549  ;;  %v337_v45 = vmul.f32 %v548_v40, %v481_v39 }
 0x118   :  { %v336_v42 = vmul.f32 %v550_v41, %v481_v39  ;;  %v552_v43 = vpop.eup %551 }
 0x119   :  { %v554_v46 = vpop.eup %553  ;;  %v351_v49 = vsel %vm93_vm1, %v337_v45, 0.0  ;;  %v339_v50 = vmul.f32 %v552_v43, %v481_v39 }
 0x11a   :  { %v348_v44 = vsel %vm93_vm1, %v336_v42, 0.0  ;;  %v556_v47 = vpop.eup %555  ;;  %v335_v53 = vmul.f32 %v554_v46, %v481_v39 }
 0x11b   :  { %349 = vadd.xlane.f32.xlu1 %v348_v44  ;;  %v334_v48 = vmul.f32 %v556_v47, %v481_v39  ;;  %v558_v51 = vpop.eup %557  ;;  %v357_v55 = vsel %vm93_vm1, %v339_v50, 0.0 }
 0x11c   :  { %v560_v54 = vpop.eup %559  ;;  %v341_v56 = vmul.f32 %v558_v51, %v481_v39  ;;  %v345_v57 = vsel %vm93_vm1, %v335_v53, 0.0 }
 0x11d   :  { %v342_v52 = vsel %vm93_vm1, %v334_v48, 0.0  ;;  %v338_v58 = vmul.f32 %v560_v54, %v481_v39  ;;  %v562_v59 = vpop.eup %561 }
 0x11e   :  { %343 = vadd.xlane.f32.xlu0 %v342_v52  ;;  %v363_v60 = vsel %vm93_vm1, %v341_v56, 0.0  ;;  %v340_v62 = vmul.f32 %v562_v59, %v481_v39 }
 0x11f   :  { %352 = vadd.xlane.f32.xlu1 %v351_v49  ;;  %v354_v61 = vsel %vm93_vm1, %v338_v58, 0.0 }
 0x120   :  { %v360_v63 = vsel %vm93_vm1, %v340_v62, 0.0 }
 0x122   :  { %346 = vadd.xlane.f32.xlu0 %v345_v57 }
 0x123   :  { %358 = vadd.xlane.f32.xlu1 %v357_v55 }
 0x126   :  { %355 = vadd.xlane.f32.xlu0 %v354_v61 }
 0x127   :  { %364 = vadd.xlane.f32.xlu1 %v363_v60 }
 0x12a   :  { %361 = vadd.xlane.f32.xlu0 %v360_v63 }
 0x1a4   :  { %v350_v1 = vpop.xlane.xlu1 %349 }
 0x1a5   :  { %v388_v11 = vrot.slane %v350_v1, %v379_v6 }
 0x1a7   :  { %v344_v5 = vpop.xlane.xlu0 %343 }
 0x1a8   :  { %v353_v4 = vpop.xlane.xlu1 %352  ;;  %v380_v9 = vrot.slane %v344_v5, %v379_v6 }
 0x1a9   :  { %v392_v12 = vrot.slane %v353_v4, %v379_v6 }
 0x1ab   :  { %v347_v8 = vpop.xlane.xlu0 %346 }
 0x1ac   :  { %v359_v7 = vpop.xlane.xlu1 %358  ;;  %v384_v10 = vrot.slane %v347_v8, %v379_v6 }
 0x1ad   :  { %v400_v19 = vrot.slane %v359_v7, %v379_v6 }
 0x1ae   :  { %v410_v13 = vsel %vm409_vm2, %v384_v10, %v380_v9 }
 0x1af   :  { %v412_v14 = vsel %vm411_vm3, %v388_v11, %v410_v13  ;;  %v356_v15 = vpop.xlane.xlu0 %355 }
 0x1b0   :  { %v414_v16 = vsel %vm413_vm4, %v392_v12, %v412_v14  ;;  %v396_v17 = vrot.slane %v356_v15, %v379_v6  ;;  %v365_v18 = vpop.xlane.xlu1 %364 }
 0x1b1   :  { %v408_v21 = vrot.slane %v365_v18, %v379_v6 }
 0x1b2   :  { %v416_v20 = vsel %vm415_vm5, %v396_v17, %v414_v16 }
 0x1b3   :  { %v362_v22 = vpop.xlane.xlu0 %361  ;;  %v418_v24 = vsel %vm417_vm6, %v400_v19, %v416_v20 }
 0x1b4   :  { %v404_v23 = vrot.slane %v362_v22, %v379_v6 }
 0x1b6   :  { %v420_v25 = vsel %vm419_vm7, %v404_v23, %v418_v24 }
 0x1b7   :  { %v422_v26 = vsel %vm421_vm8, %v408_v21, %v420_v25 }
 0x1b8   :  { %426 = vst.msk [vmem:[#allocation11] sm:$0xff] %vm425_vm9, %v422_v26 }
 0x1bf   :  { %v430_v27 = vld [vmem:[#allocation11] sm:$0xff] }
 0x1c0   :  { %v431_v28 = vsel %vm425_vm9, %v430_v27, -inf }
 0x1c1   :  { %v432_v29 = vrot.slane %v431_v28, 4 }
 0x1c3   :  { %v433_v30 = vmax.f32 %v431_v28, %v432_v29 }
 0x1c5   :  { %v434_v31 = vrot.slane %v433_v30, 2 }
 0x1c7   :  { %v435_v32 = vmax.f32 %v433_v30, %v434_v31 }
 0x1c9   :  { %v436_v33 = vrot.slane %v435_v32, 1 }
 0x1cb   :  { %v437_v34 = vmax.f32 %v435_v32, %v436_v33 }
 0x1cd   :  { %v438_v35 = vsub.f32 %v430_v27, %v437_v34 }
 0x1cf   :  { %v439_v36 = vmul.f32 1.442695, %v438_v35 }
 0x1d1   :  { %563 = vpow2.f32 %v439_v36 }
 0x1de   :  { %v564_v37 = vpop.eup %563 }
 0x1df   :  { %v441_v38 = vsel %vm425_vm9, %v564_v37, 0.0 }
 0x1e0   :  { %v442_v39 = vrot.slane %v441_v38, 4 }
 0x1e2   :  { %v443_v40 = vadd.f32 %v442_v39, %v441_v38 }
 0x1e4   :  { %v444_v41 = vrot.slane %v443_v40, 2 }
 0x1e6   :  { %v445_v42 = vadd.f32 %v444_v41, %v443_v40 }
 0x1e8   :  { %v446_v43 = vrot.slane %v445_v42, 1 }
 0x1ea   :  { %v447_v44 = vadd.f32 %v446_v43, %v445_v42 }
 0x1ec   :  { %565 = vrcp.f32 %v447_v44 }
 0x1f9   :  { %v566_v45 = vpop.eup %565 }
 0x1fa   :  { %v449_v46 = vmul.f32 %v566_v45, %v447_v44 }
 0x1fc   :  { %v450_v47 = vsub.f32 2.0, %v449_v46 }
 0x1fe   :  { %v451_v48 = vmul.f32 %v566_v45, %v450_v47 }
 0x200   :  { %v452_v49 = vmul.f32 %v564_v37, %v451_v48 }
 0x202   :  { %453 = vst.msk [vmem:[#allocation11] sm:$0xff] %vm425_vm9, %v452_v49 }
 0x203   :  { %658 = shalt.err (!%p655_p10)
}
 0x204   :  { %463 = dma.vmem_to_hbm [thread:$0]  %s461_s18, 128, %s777_s6, [#allocation5]  }
 0x205   :  { %673 = dma.done.wait [#allocation5], 128  }
 0x206   :  { %674 = vsyncadd [#allocation5], 4294967168 }
 0x207   :  { %467 = vsyncpa [#allocation4], 1 }
 0x208   :  { %468 = vsyncpa [#allocation7], 1 }
 0x209   :  { %469 = vsyncpa [#allocation10], 1 }
 0x20a   :  { %470 = vsyncpa [#allocation5], 1 }

</bundles_post_ra>
